<compile_context>
chip_gen: v7x
topology: tpu7x:2x2x1
jax: 0.10.0
libtpu: 0.0.40
codegen_flags: <defaults>
</compile_context>

<pallas_src>
import functools

import numpy as np
import jax
import jax.numpy as jnp
from jax import lax
from jax.experimental import pallas as pl
from jax.experimental.pallas import tpu as pltpu

_LANES = 128
_SUBLANES = 8


def _round_up(a, b):
    return -(-a // b) * b


def _signed_poisson_kernel(seed_ref, x_ref, o_ref, *, p_scale, block_elems):
    # seed_ref: (1,) int32 scalar-prefetch (SMEM)
    # x_ref:    (tile, 128) f32 input values (assumed in [-1, 1])
    # o_ref:    (tile, 128) f32 signed spikes in {-1, 0, +1}
    tile, lanes = x_ref.shape

    # Flat element index of every lane in this block -> independent, fully
    # deterministic random stream per element regardless of grid layout /
    # megacore sharding.
    base = pl.program_id(0) * block_elems
    row = lax.broadcasted_iota(jnp.int32, (tile, lanes), 0)
    col = lax.broadcasted_iota(jnp.int32, (tile, lanes), 1)
    idx = (base + row * lanes + col).astype(jnp.uint32)

    seed = seed_ref[0].astype(jnp.uint32)
    state = idx ^ (seed * jnp.uint32(0x9E3779B1))

    # lowbias32 integer hash -> 32 well-mixed random bits per element.
    state = state ^ (state >> 16)
    state = state * jnp.uint32(0x7FEB352D)
    state = state ^ (state >> 15)
    state = state * jnp.uint32(0x846CA68B)
    state = state ^ (state >> 16)

    x = x_ref[...]

    # Bernoulli draw in the integer domain: 24 random bits vs |x| * p * 2^24.
    bits24 = (state >> 8).astype(jnp.int32)                       # [0, 2^24)
    thresh = (jnp.abs(x) * jnp.float32(p_scale * float(1 << 24))).astype(jnp.int32)
    spike = bits24 < thresh

    # out = sign(x) on spike, 0 otherwise, via the sign-bit trick
    # (exactly +-1.0; x == 0 gives thresh == 0 -> never spikes -> 0.0).
    sign_bits = lax.bitcast_convert_type(x, jnp.uint32) & jnp.uint32(0x80000000)
    one_bits = jnp.where(spike, jnp.uint32(0x3F800000), jnp.uint32(0))
    o_ref[...] = lax.bitcast_convert_type(one_bits | sign_bits, jnp.float32)


def _choose_grid(n_rows, max_tile_rows=2048):
    """Pick (rows_padded, tile_rows, grid_steps).

    Rows are padded up to grid*tile (tile a multiple of 8, <= max_tile_rows);
    no divisor search, so tiles stay large for every shape. The grid is forced
    to >= 2 even steps (when there is enough work) so both v7x TensorCores are
    used and the pipeline has steps to hide DMA edges.
    """
    rows8 = _round_up(max(n_rows, 1), _SUBLANES)
    if rows8 >= 2 * _SUBLANES:
        grid = max(2, -(-rows8 // max_tile_rows))
        if grid % 2:
            grid += 1
    else:
        grid = 1
    tile = _round_up(-(-rows8 // grid), _SUBLANES)
    tile = min(tile, max_tile_rows) if tile <= max_tile_rows else tile
    rows_pad = tile * grid
    return rows_pad, tile, grid


def signed_poisson_encode_step(x, f_max=1000.0, dt=0.001, seed=0, max_tile_rows=2048):
    x = jnp.asarray(x, dtype=jnp.float32)
    orig_shape = x.shape
    n = int(np.prod(orig_shape)) if orig_shape else 1

    n_rows = -(-n // _LANES)
    rows_pad, tile, grid = _choose_grid(n_rows, max_tile_rows)
    n_pad = rows_pad * _LANES

    flat = x.reshape(-1)
    if n_pad != n:
        # TODO(synk): ragged tail could be masked in-kernel (scalar-prefetch the
        # true element count) to avoid this pad/slice HBM copy; only taken when
        # numel doesn't already match the padded block layout. Padded zeros
        # encode to 0 and are sliced off, so the result is unchanged.
        flat = jnp.pad(flat, (0, n_pad - n))
    x2d = flat.reshape(rows_pad, _LANES)

    seed_arr = jnp.asarray([seed], dtype=jnp.int32)
    p_scale = float(f_max) * float(dt)

    kernel = functools.partial(
        _signed_poisson_kernel, p_scale=p_scale, block_elems=tile * _LANES
    )

    # TODO(synk): if downstream consumers accept int8/bf16 spikes, narrowing the
    # output dtype cuts store bandwidth ~25-35% on this HBM-bound kernel.
    out2d = pl.pallas_call(
        kernel,
        out_shape=jax.ShapeDtypeStruct((rows_pad, _LANES), jnp.float32),
        grid_spec=pltpu.PrefetchScalarGridSpec(
            num_scalar_prefetch=1,
            grid=(grid,),
            in_specs=[pl.BlockSpec((tile, _LANES), lambda i, seed: (i, 0))],
            out_specs=pl.BlockSpec((tile, _LANES), lambda i, seed: (i, 0)),
        ),
        compiler_params=pltpu.CompilerParams(
            dimension_semantics=("parallel",),
        ),
        cost_estimate=pl.CostEstimate(
            flops=20 * n_pad, transcendentals=0, bytes_accessed=8 * n_pad
        ),
    )(seed_arr, x2d)

    out = out2d.reshape(-1)
    if n_pad != n:
        out = out[:n]
    return out.reshape(orig_shape)


class SignedPoissonEncoderStep:
    """JAX/Pallas port of norse SignedPoissonEncoderStep.

    Encodes values in [-1, 1] into signed spikes in {-1, 0, +1} with spike
    probability f_max * dt * |x| and the sign of the input.
    """

    def __init__(self, f_max: float = 1000, dt: float = 0.001):
        self.f_max = f_max
        self.dt = dt

    def __call__(self, x, seed=0):
        return signed_poisson_encode_step(x, f_max=self.f_max, dt=self.dt, seed=seed)


if __name__ == "__main__":
    key = jax.random.PRNGKey(0)

    # Small example consistent with the module: values in [-1, 1].
    x = jax.random.uniform(key, (2, 4, 16, 16), dtype=jnp.float32, minval=-1.0, maxval=1.0)

    enc = SignedPoissonEncoderStep(f_max=1000, dt=0.001)   # p = |x|
    y = jax.block_until_ready(enc(x, seed=0))

    y_np = np.asarray(y)
    x_np = np.asarray(x)

    # 1) shape & codomain {-1, 0, +1}
    assert y_np.shape == x_np.shape
    assert np.all(np.isin(y_np, [-1.0, 0.0, 1.0]))

    # 2) spikes always carry the sign of the input (out * x >= 0 everywhere)
    assert np.all(y_np * x_np >= 0.0)

    # 3) statistical check: spike rate ~= E[f_max*dt*|x|] = mean(|x|)
    rate = np.abs(y_np).mean()
    expected = np.abs(x_np).mean()
    assert abs(rate - expected) < 0.05, (rate, expected)

    # 4) different seeds give different spike trains
    y2 = jax.block_until_ready(enc(x, seed=1))
    assert not np.array_equal(np.asarray(y2), y_np)

    # 5) deterministic edge cases (p=1 -> certain spike; x=0 -> no spike);
    #    also exercises the ragged pad/slice path (numel=5).
    small = jnp.asarray([-1.0, -0.5, 0.0, 0.5, 1.0], dtype=jnp.float32)
    ys = np.asarray(jax.block_until_ready(enc(small, seed=0)))
    assert ys.shape == (5,)
    assert ys[0] == -1.0 and ys[4] == 1.0 and ys[2] == 0.0
    assert ys[1] in (-1.0, 0.0) and ys[3] in (0.0, 1.0)

    print("KERNEL_OK")
</pallas_src>

<mosaic_0001>
module attributes {stable_mosaic.version = 11 : i64} {
  func.func @_signed_poisson_kernel(%arg0: i32, %arg1: memref<1xi32, #tpu.memory_space<smem>>, %arg2: memref<8x128xf32, #tpu.memory_space<vmem>>, %arg3: memref<8x128xf32, #tpu.memory_space<vmem>>) attributes {dimension_semantics = [#tpu.dimension_semantics<parallel>], iteration_bounds = array<i64: 2>, scalar_prefetch = 1 : i64, scratch_operands = 0 : i64, tpu.core_type = #tpu.core_type<tc>, window_params = [{transform_indices = @transform_0, window_bounds = array<i64: 8, 128>}, {transform_indices = @transform_1, window_bounds = array<i64: 8, 128>}]} {
    %c1024_i32 = arith.constant 1024 : i32
    %0 = arith.muli %arg0, %c1024_i32 : i32
    %1 = tpu.iota {dimensions = array<i32: 0>} : vector<8x128xi32>
    %2 = tpu.iota {dimensions = array<i32: 1>} : vector<8x128xi32>
    %c128_i32 = arith.constant 128 : i32
    %3 = vector.broadcast %c128_i32 : i32 to vector<8x128xi32>
    %4 = arith.muli %1, %3 : vector<8x128xi32>
    %5 = vector.broadcast %0 : i32 to vector<8x128xi32>
    %6 = arith.addi %5, %4 : vector<8x128xi32>
    %7 = arith.addi %6, %2 : vector<8x128xi32>
    %c0 = arith.constant 0 : index
    %8 = memref.load %arg1[%c0] : memref<1xi32, #tpu.memory_space<smem>>
    %c-1640531535_i32 = arith.constant -1640531535 : i32
    %9 = arith.muli %8, %c-1640531535_i32 : i32
    %10 = vector.broadcast %9 : i32 to vector<8x128xi32>
    %11 = arith.xori %7, %10 : vector<8x128xi32>
    %c16_i32 = arith.constant 16 : i32
    %12 = vector.broadcast %c16_i32 : i32 to vector<8x128xi32>
    %13 = arith.shrui %11, %12 : vector<8x128xi32>
    %14 = arith.xori %11, %13 : vector<8x128xi32>
    %c2146121005_i32 = arith.constant 2146121005 : i32
    %15 = vector.broadcast %c2146121005_i32 : i32 to vector<8x128xi32>
    %16 = arith.muli %14, %15 : vector<8x128xi32>
    %c15_i32 = arith.constant 15 : i32
    %17 = vector.broadcast %c15_i32 : i32 to vector<8x128xi32>
    %18 = arith.shrui %16, %17 : vector<8x128xi32>
    %19 = arith.xori %16, %18 : vector<8x128xi32>
    %c-2073254261_i32 = arith.constant -2073254261 : i32
    %20 = vector.broadcast %c-2073254261_i32 : i32 to vector<8x128xi32>
    %21 = arith.muli %19, %20 : vector<8x128xi32>
    %c16_i32_0 = arith.constant 16 : i32
    %22 = vector.broadcast %c16_i32_0 : i32 to vector<8x128xi32>
    %23 = arith.shrui %21, %22 : vector<8x128xi32>
    %24 = arith.xori %21, %23 : vector<8x128xi32>
    %c0_1 = arith.constant 0 : index
    %c0_2 = arith.constant 0 : index
    %25 = vector.load %arg2[%c0_1, %c0_2] : memref<8x128xf32, #tpu.memory_space<vmem>>, vector<8x128xf32>
    %c8_i32 = arith.constant 8 : i32
    %26 = vector.broadcast %c8_i32 : i32 to vector<8x128xi32>
    %27 = arith.shrui %24, %26 : vector<8x128xi32>
    %28 = math.absf %25 : vector<8x128xf32>
    %cst = arith.constant 0x4B800000 : f32
    %29 = vector.broadcast %cst : f32 to vector<8x128xf32>
    %30 = arith.mulf %28, %29 : vector<8x128xf32>
    %31 = arith.fptosi %30 : vector<8x128xf32> to vector<8x128xi32>
    %32 = arith.cmpi slt, %27, %31 : vector<8x128xi32>
    %33 = tpu.bitcast %25 : vector<8x128xf32> -> vector<8x128xi32>
    %c-2147483648_i32 = arith.constant -2147483648 : i32
    %34 = vector.broadcast %c-2147483648_i32 : i32 to vector<8x128xi32>
    %35 = arith.andi %33, %34 : vector<8x128xi32>
    %c1065353216_i32 = arith.constant 1065353216 : i32
    %c0_i32 = arith.constant 0 : i32
    %36 = vector.broadcast %c1065353216_i32 : i32 to vector<8x128xi32>
    %37 = vector.broadcast %c0_i32 : i32 to vector<8x128xi32>
    %38 = arith.select %32, %36, %37 : vector<8x128xi1>, vector<8x128xi32>
    %39 = arith.ori %38, %35 : vector<8x128xi32>
    %40 = tpu.bitcast %39 : vector<8x128xi32> -> vector<8x128xf32>
    %c0_3 = arith.constant 0 : index
    %c0_4 = arith.constant 0 : index
    %41 = vector.load %arg3[%c0_3, %c0_4] : memref<8x128xf32, #tpu.memory_space<vmem>>, vector<8x128xf32>
    tpu.vector_store %arg3[%c0_3, %c0_4], %40 {strides = array<i32>} : memref<8x128xf32, #tpu.memory_space<vmem>>, vector<8x128xf32>,
    return
  }
  func.func @transform_0(%arg0: i32, %arg1: memref<1xi32, #tpu.memory_space<smem>>) -> (i32, i32) {
    %c0_i32 = arith.constant 0 : i32
    %c0_i32_0 = arith.constant 0 : i32
    return %arg0, %c0_i32 : i32, i32
  }
  func.func @transform_1(%arg0: i32, %arg1: memref<1xi32, #tpu.memory_space<smem>>) -> (i32, i32) {
    %c0_i32 = arith.constant 0 : i32
    %c0_i32_0 = arith.constant 0 : i32
    return %arg0, %c0_i32 : i32, i32
  }
}

</mosaic_0001>

<bundles_post_ra>
// kernel: tpu_custom_call.1
= control target key start
LH: loop header
LB: loop body
LE: loop exit
PB: predicated region body
PF: predicated region fallthrough
CT: control target
= control target key end

     0   :  { %s598_s0 = inlined_call_operand.<no memory space> [shape: s32[1], index: 0, kind: input, shape index: {}]   ;;  %s599_s1 = inlined_call_operand.hbm [shape: f32[16,128], index: 1, kind: input, shape index: {}]   ;;  %s600_s2 = inlined_call_operand.hbm [shape: f32[16,128], index: 2, kind: output, shape index: {}]  }
   0x1   :  { %7 = sst [smem:[#allocation3]] %s598_s0 }
   0x2   :  { %8 = vsyncpa [#allocation5], 0 }
   0x3   :  { %10 = vsyncpa [#allocation5 + $0x1], 0 }
   0x4   :  { %11 = vsyncpa [#allocation6], 0 }
   0x5   :  { %13 = vsyncpa [#allocation6 + $0x1], 0  ;;  %s432_s11 = smov 0   ;;  %s434_s12 = smov 0  }
   0x6   :  { %s436_s13 = smov 0   ;;  %s438_s14 = smov 0  }
   0x7 LB: > { %s453_s0 = sadd.s32 4294967295, %s409_s14   ;;  %s251_s15 = sadd.s32 4294967294, %s409_s14   ;;  %s409_s14 = sphi %s438_s14, %s615_s14   ;;  %s405_s13 = sphi %s436_s13, %s614_s13   ;;  %s401_s12 = sphi %s434_s12, %s613_s12   ;;  %s397_s11 = sphi %s432_s11, %s612_s11  }
   0x8   : > { %s457_s16 = sadd.s32 1, %s409_s14   ;;  %s26_s17 = sadd.s32 1, %s405_s13 }
   0x9   : > { %s23_s18 = ssub.s32 %s409_s14, %s457_s16  ;;  %p33_p0 = scmp.ne.s32.totalorder %s405_s13, %s401_s12 }
   0xa   : > { %p24_p1 = scmp.eq.s32.totalorder %s23_s18, 0  ;;  %p34_p2 = scmp.eq.s32.totalorder %s409_s14, 0 }
   0xb   : > { %p39_p3 = scmp.ne.s32.totalorder %s401_s12, %s397_s11  ;;  %p40_p4 = scmp.eq.s32.totalorder %s453_s0, 0 }
   0xc   : > { %s469_s19 = scalar_select %p24_p1, %s405_s13, %s26_s17  }
   0xd   : > { %p471_p5 = por %p34_p2, %p33_p0  ;;  %p475_p6 = por %p40_p4, %p39_p3 }
   0xe   : > { %p63_p7 = scmp.eq.s32.totalorder %s453_s0, 1  ;;  %p69_p8 = scmp.eq.s32.totalorder %s251_s15, 1 }
   0xf   : > { %p278_p10 = scmp.lt.s32.totalorder %s409_s14, 2  ;;  %s89_s24 = sand.u32 1, %s405_s13  }
  0x10   : > { %p482_p11 = por %p63_p7, %p33_p0  ;;  %p486_p12 = por %p69_p8, %p39_p3 }
  0x11   : > { %s255_s25 = sshll.u32 %s409_s14, 7  ;;  %s254_s26 = sshll.u32 %s89_s24, 3 }
  0x12   : > { %s604_s22 = scalar_select %p482_p11, 1, 0 }
  0x13   : > { %s605_s23 = scalar_select %p486_p12, 1, 0 }
  0x14   : > { %s495_s29 = scalar_lea.hbm %s599_s1, %s255_s25  ;;  %s93_s30 = scalar_lea.vmem [#allocation4], %s254_s26 }
  0x15   : > { %s100_s3 = sshll.u32 %s93_s30, 4  ;;  %p499_p13 = pnand %p278_p10, %p471_p5  ;;  %s503_s3 = int_to_ptr.vmem [resolvable:$true] %s100_s3 }
  0x16   : > { %s90_s5 = scalar_lea.sflag [#allocation5], %s89_s24  ;;  %s313_s6 = scalar_lea.hbm %s495_s29, 128 }
  0x17   : > { %p314_p2 = scmp.ne.s32.totalorder %s495_s29, %s313_s6  ;;  %p315_p3 = pneg %p499_p13 }
  0x18   : > { %s318_s9 = scalar_lea.hbm %s599_s1, 256  ;;  %p319_p5 = scmp.lt.u32.totalorder %s495_s29, %s599_s1 }
  0x19   : > { %p316_p4 = pnand %p315_p3, %p314_p2  ;;  %p320_p8 = scmp.lt.u32.totalorder %s318_s9, %s313_s6 }
  0x1a   : > { %p322_p9 = scmp.lt.u32.totalorder %s313_s6, %s495_s29 }
  0x1b   : > { %p317_p7 = pneg %p316_p4  ;;  %p321_p10 = por %p320_p8, %p319_p5 }
  0x1d   : > { %p323_p0 = por %p322_p9, %p321_p10 }
  0x1f   : > { %p324_p1 = pnand %p323_p0, %p317_p7 }
  0x21   : > { %327 = shalt.err (!%p324_p1)
}
  0x22   : > { %s328_s17 = scalar_lea.vmem %s503_s3, 128  ;;  %s411_s18 = smov [#allocation4]  }
  0x23   : > { %p329_p2 = scmp.ne.s32.totalorder %s503_s3, %s328_s17  ;;  %s333_s20 = sshll.u32 %s411_s18, 4  ;;  %s334_s20 = int_to_ptr.vmem [resolvable:$false] %s333_s20 }
  0x24   : > { %s335_s24 = scalar_lea.vmem %s334_s20, 256  ;;  %p336_p11 = scmp.lt.s32.totalorder %s503_s3, %s334_s20 }
  0x25   : > { %p331_p4 = pnand %p329_p2, %p315_p3  ;;  %p337_p5 = scmp.lt.s32.totalorder %s335_s24, %s328_s17 }
  0x27   : > { %p332_p12 = pneg %p331_p4  ;;  %p338_p8 = por %p337_p5, %p336_p11 }
  0x29   : > { %p339_p9 = pnand %p338_p8, %p332_p12 }
  0x2b   : > { %342 = shalt.err (!%p339_p9)
}
  0x2c   : > { %273 = dma.hbm_to_vmem [thread:$0]  (!%p499_p13), %s495_s29, 128, %s503_s3, %s90_s5  }
  0x2d   : > { %p607_p0 = scmp.lt.s32.totalorder %s409_s14, 3  ;;  %p608_p1 = scmp.ge.s32.totalorder %s409_s14, 1 }
  0x2f   : > { %p106_p3 = pnand %p608_p1, %p607_p0 }
  0x30   : > { %s537_s25 = sand.u32 (!%p106_p3), 1, %s401_s12  }
  0x31   : > { %109 = sbr.rel (%p106_p3) target bundleno = 105 (0x69), region = 24  ;;  %s257_s26 = sshll.u32 (!%p106_p3), %s537_s25, 3 }
  0x32   : > { %s112_s27 = scalar_lea.sflag (!%p106_p3), [#allocation5], %s537_s25  ;;  %s115_s28 = scalar_lea.vmem (!%p106_p3), [#allocation4], %s257_s26 }
  0x38   : > { %388 = dma.done.wait (%p475_p6), %s112_s27, 128  }
  0x39   : > { %390 = vsyncadd (%p475_p6), %s112_s27, 4294967168  ;;  %s259_s29 = sshll.u32 %s453_s0, 10  ;;  %v135_v0 = vlaneseq  ;;  %s143_s30 = sld [smem:[#allocation3]]  ;;  %v155_v9 = vld [vmem:[%s115_s28] sm:$0xff]  ;;  %v412_v24 = vmov 0  }
  0x3a   : > { %v140_v2 = vstv %s259_s29  ;;  %v157_v12 = vand.u32 2147483647, %v155_v9  ;;  %v162_v23 = vand.u32 2147483648, %v155_v9  ;;  %s133_s21 = scalar_lea.vmem [#allocation7], %s257_s26  ;;  %s261_s5 = sshll.u32 %s453_s0, 7 }
  0x3b   : > { %v136_v1 = vshrl.u32 %v135_v0, 7  ;;  %v138_v3 = vand.u32 127, %v135_v0  ;;  %s181_s4 = sshll.u32 %s133_s21, 4  ;;  %s556_s8 = scalar_lea.hbm %s600_s2, %s261_s5  ;;  %s551_s4 = int_to_ptr.vmem [resolvable:$true] %s181_s4 }
  0x3c   : > { %v158_v15 = vmul.f32 16777216.0, %v157_v12  ;;  %s168_s9 = scalar_lea.sflag [#allocation6], %s537_s25  ;;  %s343_s10 = scalar_lea.vmem %s551_s4, 128 }
  0x3d   : > { %v139_v4 = vmul.u32 128, %v136_v1  ;;  %p344_p6 = scmp.ne.s32.totalorder %s551_s4, %s343_s10  ;;  %p609_p11 = scmp.ne.s32.totalorder %s604_s22, 0 }
  0x3e   : > { %v264_v18 = vtrunc.f32 %v158_v15  ;;  %s413_s0 = smov [#allocation7]  }
  0x3f   : > { %v141_v5 = vadd.s32 %v140_v2, %v139_v4  ;;  %s144_s3 = smul.u32 2654435761, %s143_s30  ;;  %p345_p12 = pnand %p344_p6, %p609_p11 }
  0x40   : > { %v265_v21 = vcvt.f32.s32 %v264_v18  ;;  %s347_s15 = sshll.u32 %s413_s0, 4  ;;  %s348_s15 = int_to_ptr.vmem [resolvable:$false] %s347_s15 }
  0x41   : > { %v142_v6 = vadd.s32 %v141_v5, %v138_v3  ;;  %v145_v7 = vstv %s144_s3  ;;  %p346_p13 = pneg %p345_p12  ;;  %s349_s17 = scalar_lea.vmem %s348_s15, 256 }
  0x42   : > { %p350_p7 = scmp.lt.s32.totalorder %s551_s4, %s348_s15  ;;  %p351_p10 = scmp.lt.s32.totalorder %s349_s17, %s343_s10 }
  0x43   : > { %v146_v8 = vxor.u32 %v145_v7, %v142_v6 }
  0x44   : > { %p352_p2 = por %p351_p10, %p350_p7 }
  0x45   : > { %v147_v10 = vshrl.u32 %v146_v8, 16 }
  0x46   : > { %p353_p4 = pnand %p352_p2, %p346_p13 }
  0x47   : > { %v148_v11 = vxor.u32 %v147_v10, %v146_v8 }
  0x49   : > { %v149_v13 = vmul.u32 2146121005, %v148_v11 }
  0x4b   : > { %v150_v14 = vshrl.u32 %v149_v13, 15 }
  0x4d   : > { %v151_v16 = vxor.u32 %v150_v14, %v149_v13 }
  0x4f   : > { %v152_v17 = vmul.u32 2221713035, %v151_v16 }
  0x51   : > { %v153_v19 = vshrl.u32 %v152_v17, 16 }
  0x53   : > { %v154_v20 = vxor.u32 %v153_v19, %v152_v17 }
  0x55   : > { %v156_v22 = vshrl.u32 %v154_v20, 8 }
  0x57   : > { %vm160_vm0 = vcmp.lt.s32.totalorder %v156_v22, %v265_v21 }
  0x58   : > { %v163_v25 = vsel %vm160_vm0, 1065353216, %v412_v24 }
  0x59   : > { %v164_v26 = vor.u32 %v163_v25, %v162_v23 }
  0x5b   : > { %166 = vst [vmem:[%s133_s21] sm:$0xff] %v164_v26 }
  0x5c   : > { %356 = shalt.err (!%p353_p4)
}
  0x5d   : > { %s357_s18 = scalar_lea.hbm %s556_s8, 128  ;;  %s361_s25 = scalar_lea.hbm %s600_s2, 256 }
  0x5e   : > { %p358_p5 = scmp.ne.s32.totalorder %s556_s8, %s357_s18  ;;  %p362_p0 = scmp.lt.u32.totalorder %s556_s8, %s600_s2 }
  0x5f   : > { %p363_p1 = scmp.lt.u32.totalorder %s361_s25, %s357_s18  ;;  %p365_p6 = scmp.lt.u32.totalorder %s357_s18, %s556_s8 }
  0x60   : > { %p359_p8 = pnand %p358_p5, %p609_p11 }
  0x61   : > { %p364_p3 = por %p363_p1, %p362_p0 }
  0x62   : > { %p360_p9 = pneg %p359_p8 }
  0x63   : > { %p366_p12 = por %p365_p6, %p364_p3 }
  0x65   : > { %p367_p13 = pnand %p366_p12, %p360_p9 }
  0x67   : > { %370 = shalt.err (!%p367_p13)
}
  0x68   : > { %268 = dma.vmem_to_hbm [thread:$0]  (%p609_p11), %s551_s4, 128, %s556_s8, %s168_s9  }
  0x69 PF: > { %s193_s28 = sand.u32 1, %s397_s11   ;;  %p610_p7 = scmp.ne.s32.totalorder %s605_s23, 0 }
  0x6a   : > { %p611_p10 = scmp.ge.s32.totalorder %s409_s14, 2  ;;  %s194_s29 = scalar_lea.sflag [#allocation6], %s193_s28 }
  0x6c   : > { %p275_p2 = pnand %p611_p10, %p610_p7 }
  0x6e   : > { %392 = dma.done.wait (!%p275_p2), %s194_s29, 128  }
  0x6f   : > { %394 = vsyncadd (!%p275_p2), %s194_s29, 4294967168  ;;  %p16_p4 = scmp.ge.s32.totalorder %s457_s16, 4   ;;  %s612_s11 = smov %s401_s12 }
  0x70   : > { %s613_s12 = smov %s405_s13  ;;  %s614_s13 = smov %s469_s19 }
  0x71   : > { %s615_s14 = smov %s457_s16  ;;  %18 = sbr.rel (!%p16_p4) target bundleno = 7 (0x7), region = 69 }
  0x78   :  { %199 = vsyncpa [#allocation5], 1 }
  0x79   :  { %201 = vsyncpa [#allocation5 + $0x1], 1 }
  0x7a   :  { %202 = vsyncpa [#allocation6], 1 }
  0x7b   :  { %204 = vsyncpa [#allocation6 + $0x1], 1 }

</bundles_post_ra>
